<compile_context>
chip_gen: v5e
topology: v5e:2x2
jax: 0.10.0
libtpu: 0.0.40
codegen_flags: <defaults>
</compile_context>

<pallas_src>
import functools
from typing import NamedTuple, Tuple

import jax
import jax.numpy as jnp
from jax.experimental import pallas as pl
from jax.experimental.pallas import tpu as pltpu


def _round_up(x, m):
    return (x + m - 1) // m * m


# ------------------------------ Pallas kernel --------------------------------
def _fused_pca_kernel(lvl_ref, w_ref, c_ref, mu_ref, o_ref):
    # lvl_ref : SMEM (T,) int32 tile->level map (consumed by the index_maps)
    # w_ref   : (Bp, Maug) f32   per-level weights (zero-padded rows/cols)
    # c_ref   : (Maug, tn) bf16  component tile for this grid step
    # mu_ref  : (1, tn)    f32   mean tile for this grid step
    # o_ref   : (B, tn)    f32   output tile (B = true batch, no padding)
    del lvl_ref
    acc = jnp.dot(w_ref[...], c_ref[...].astype(jnp.float32),
                  preferred_element_type=jnp.float32)          # MXU, f32 acc
    b = o_ref.shape[0]
    o_ref[...] = (acc[:b] + mu_ref[...]).astype(o_ref.dtype)    # exact f32 mean add


class _Meta(NamedTuple):
    batch: int
    bp: int
    mmax: int
    maug: int
    tn: int
    level_dims: Tuple[int, ...]
    level_modes: Tuple[int, ...]
    level_tiles: Tuple[int, ...]


@functools.partial(jax.jit, static_argnames=("meta",))
def _lodpca_fused(level_map, comp_fused, mean_fused, weights, num_modes, meta):
    B, Bp = meta.batch, meta.bp
    Mmax, Maug, tn = meta.mmax, meta.maug, meta.tn
    total_tiles = sum(meta.level_tiles)
    n_pad = total_tiles * tn

    # Per-level weights, zero-padded to (Bp, Maug); modes >= num_modes are
    # zero-masked so every num_modes reuses the same compiled kernel.
    nm = jnp.minimum(jnp.asarray(num_modes, jnp.int32), Mmax)
    mode_mask = (jnp.arange(Maug, dtype=jnp.int32) < nm).astype(jnp.float32)
    w_blocks = []
    for w, m_lvl in zip(weights, meta.level_modes):
        wp = jnp.zeros((Bp, Maug), jnp.float32)
        wp = wp.at[:B, :m_lvl].set(w.astype(jnp.float32))
        w_blocks.append(wp)
    w_stacked = jnp.stack(w_blocks, axis=0) * mode_mask[None, None, :]  # (L,Bp,Maug)

    flops = 2 * Bp * Maug * n_pad
    bytes_accessed = (comp_fused.size * comp_fused.dtype.itemsize
                      + mean_fused.size * 4 + w_stacked.size * 4
                      + B * n_pad * 4)

    out = pl.pallas_call(
        _fused_pca_kernel,
        out_shape=jax.ShapeDtypeStruct((B, n_pad), jnp.float32),
        grid_spec=pltpu.PrefetchScalarGridSpec(
            num_scalar_prefetch=1,
            grid=(total_tiles,),
            in_specs=[
                # tile -> level lookup selects the matching weight slab;
                # level_map is sorted so the slab only re-DMAs at level
                # boundaries (effectively resident, a few KiB).
                pl.BlockSpec((None, Bp, Maug), lambda j, lvl: (lvl[j], 0, 0)),
                # tile-major bf16 components: one contiguous DMA per step
                pl.BlockSpec((None, Maug, tn), lambda j, lvl: (j, 0, 0)),
                # tile-major f32 mean (VPU epilogue add)
                pl.BlockSpec((None, 1, tn), lambda j, lvl: (j, 0, 0)),
            ],
            out_specs=pl.BlockSpec((B, tn), lambda j, lvl: (0, j)),
        ),
        compiler_params=pltpu.CompilerParams(
            dimension_semantics=("parallel",)),
        cost_estimate=pl.CostEstimate(flops=flops, transcendentals=0,
                                      bytes_accessed=bytes_accessed),
    )(level_map, w_stacked, comp_fused, mean_fused)
    return out


# ------------------------------ LoDPCA wrapper --------------------------------
class LoDPCA:
    """JAX/Pallas port of `deformer.latents.LoDPCA` (forward pass only).

    `data` is a list of per-LoD-level (k, n_level) matrices; PCA parameters
    (mean + principal directions) are fit per level in plain JAX (setup glue),
    the reconstruction matmuls for all levels run in ONE Pallas kernel call.
    """

    def __init__(self, data, *, tn=4096, comp_dtype=jnp.bfloat16):
        self.means = []
        self.components = []   # per level: (k, n_level) right singular vectors
        for level in data:
            level = jnp.asarray(level, jnp.float32)
            mean = level.mean(axis=0)
            centered = level - mean
            # plain-JAX SVD: parameter setup, not the hot path
            _, _, vt = jnp.linalg.svd(centered, full_matrices=False)
            self.means.append(mean)
            self.components.append(vt)

        level_dims = tuple(int(c.shape[1]) for c in self.components)
        level_modes = tuple(int(c.shape[0]) for c in self.components)
        mmax = max(level_modes)

        # bf16 sublane packing is (16, 128); round K up so packing is clean.
        pack = 16 if comp_dtype == jnp.bfloat16 else 8
        maug = _round_up(mmax, pack)

        # Large lane tile amortizes the fixed per-grid-step overhead; clamp to
        # the largest level so tiny configs are not over-padded.
        # TODO(synk): levels much smaller than tn still stream zero padding;
        # could route tiny levels through a plain XLA dot instead.
        tn = max(512, min(int(tn), _round_up(max(level_dims), 128)))
        self.tn = tn

        level_tiles = tuple(pl.cdiv(n, tn) for n in level_dims)

        # Tile-major fused components (T, Maug, tn) in bf16 and the matching
        # f32 mean tiles (T, 1, tn): each grid step is one contiguous DMA.
        comp_tiles, mean_tiles, level_map = [], [], []
        for lvl, (comp, mean, nt, n_lvl) in enumerate(
                zip(self.components, self.means, level_tiles, level_dims)):
            m_lvl = comp.shape[0]
            for t in range(nt):
                lo = t * tn
                hi = min(lo + tn, n_lvl)
                c_blk = jnp.zeros((maug, tn), comp_dtype)
                c_blk = c_blk.at[:m_lvl, :hi - lo].set(
                    comp[:, lo:hi].astype(comp_dtype))
                m_blk = jnp.zeros((1, tn), jnp.float32)
                m_blk = m_blk.at[0, :hi - lo].set(mean[lo:hi])
                comp_tiles.append(c_blk)
                mean_tiles.append(m_blk)
                level_map.append(lvl)
        self.comp_fused = jnp.stack(comp_tiles, axis=0)   # (T, Maug, tn) bf16
        self.mean_fused = jnp.stack(mean_tiles, axis=0)   # (T, 1, tn)    f32
        self.level_map = jnp.asarray(level_map, jnp.int32)  # sorted by level

        # lane offset of each level inside the fused output
        offs, acc = [], 0
        for nt in level_tiles:
            offs.append(acc * tn)
            acc += nt
        self._level_offsets = tuple(offs)

        self._meta_base = dict(mmax=mmax, maug=maug, tn=tn,
                               level_dims=level_dims, level_modes=level_modes,
                               level_tiles=level_tiles)

    def __len__(self):
        return self.components[-1].shape[0]

    def forward_fused(self, weights, num_modes=None):
        """Raw fused (B, n_pad) reconstruction (no per-level split pass).

        Level l starts at lane offset self._level_offsets[l].
        """
        B = int(weights[0].shape[0])
        nm = self._meta_base["mmax"] if num_modes is None else int(num_modes)
        nm = max(0, min(nm, self._meta_base["mmax"]))
        meta = _Meta(batch=B, bp=max(8, _round_up(B, 8)), **self._meta_base)
        return _lodpca_fused(self.level_map, self.comp_fused, self.mean_fused,
                             tuple(jnp.asarray(w) for w in weights),
                             jnp.int32(nm), meta)

    def forward(self, weights, num_modes=None):
        fused = self.forward_fused(weights, num_modes)
        # Per-level column split: the only post-kernel pass, kept to match the
        # PyTorch list-of-levels return; use forward_fused() to avoid it.
        return [fused[:, off:off + n]
                for off, n in zip(self._level_offsets,
                                  self._meta_base["level_dims"])]

    __call__ = forward


# ------------------------------ demo / test -----------------------------------
if __name__ == "__main__":
    key = jax.random.PRNGKey(0)

    batch = 2        # number of latents being reconstructed
    k_examples = 8   # PCA training examples -> number of modes
    channels = 4
    # Two LoD levels of grid latents (c, r, r, r) -> flattened dims c * r^3
    level_dims = [channels * 4 ** 3, channels * 8 ** 3]   # 256, 2048

    keys = jax.random.split(key, 2 * len(level_dims))

    # synthetic "training" data per level (k x n matrices)
    train_data = [
        jax.random.normal(keys[i], (k_examples, n), jnp.float32)
        for i, n in enumerate(level_dims)
    ]
    model = LoDPCA(train_data)

    # per-level PCA weights for `batch` samples
    weights = [
        jax.random.normal(keys[len(level_dims) + i], (batch, k_examples),
                          jnp.float32)
        for i in range(len(level_dims))
    ]

    out = jax.block_until_ready(model(weights))                      # full modes
    out_trunc = jax.block_until_ready(model(weights, num_modes=4))   # truncated

    # correctness check vs. plain-JAX references
    for w, comp, mean, got, got_t in zip(weights, model.components,
                                         model.means, out, out_trunc):
        comp_q = comp.astype(jnp.bfloat16).astype(jnp.float32)  # kernel stores bf16
        ref = w @ comp_q + mean
        ref_t = w[:, :4] @ comp_q[:4] + mean
        ref_f32 = w @ comp + mean
        assert got.shape == ref.shape and got.dtype == jnp.float32
        assert jnp.allclose(got, ref, atol=5e-3, rtol=5e-3), \
            float(jnp.abs(got - ref).max())
        assert jnp.allclose(got_t, ref_t, atol=5e-3, rtol=5e-3), \
            float(jnp.abs(got_t - ref_t).max())
        # sanity vs exact-f32 PCA reconstruction (bf16 component rounding only)
        assert jnp.allclose(got, ref_f32, atol=3e-2, rtol=3e-2), \
            float(jnp.abs(got - ref_f32).max())

    print("KERNEL_OK")
</pallas_src>

<mosaic_0001>
module attributes {stable_mosaic.version = 11 : i64} {
  func.func @_fused_pca_kernel(%arg0: i32, %arg1: memref<2xi32, #tpu.memory_space<smem>>, %arg2: memref<1x8x16xf32, #tpu.memory_space<vmem>>, %arg3: memref<1x16x2048xbf16, #tpu.memory_space<vmem>>, %arg4: memref<1x1x2048xf32, #tpu.memory_space<vmem>>, %arg5: memref<2x2048xf32, #tpu.memory_space<vmem>>) attributes {dimension_semantics = [#tpu.dimension_semantics<parallel>], iteration_bounds = array<i64: 2>, scalar_prefetch = 1 : i64, scratch_operands = 0 : i64, tpu.core_type = #tpu.core_type<tc>, window_params = [{transform_indices = @transform_0, window_bounds = array<i64: 1, 8, 16>}, {transform_indices = @transform_1, window_bounds = array<i64: 1, 16, 2048>}, {transform_indices = @transform_2, window_bounds = array<i64: 1, 1, 2048>}, {transform_indices = @transform_3, window_bounds = array<i64: 2, 2048>}]} {
    %c0 = arith.constant 0 : index
    %c0_0 = arith.constant 0 : index
    %c0_1 = arith.constant 0 : index
    %0 = vector.load %arg2[%c0, %c0_0, %c0_1] : memref<1x8x16xf32, #tpu.memory_space<vmem>>, vector<1x8x16xf32>
    %1 = vector.shape_cast %0 : vector<1x8x16xf32> to vector<8x16xf32>
    %c0_2 = arith.constant 0 : index
    %c0_3 = arith.constant 0 : index
    %c0_4 = arith.constant 0 : index
    %2 = vector.load %arg3[%c0_2, %c0_3, %c0_4] : memref<1x16x2048xbf16, #tpu.memory_space<vmem>>, vector<1x16x2048xbf16>
    %3 = vector.shape_cast %2 : vector<1x16x2048xbf16> to vector<16x2048xbf16>
    %4 = arith.extf %3 : vector<16x2048xbf16> to vector<16x2048xf32>
    %cst = arith.constant dense<0.000000e+00> : vector<8x2048xf32>
    %5 = tpu.matmul %1, %4, %cst {dimension_numbers = #tpu.dot_dimension_numbers<[1], [0], [0], [1], [0, 0, 1, 1], [], []>} : vector<8x16xf32>, vector<16x2048xf32>, vector<8x2048xf32> -> vector<8x2048xf32>
    %6 = vector.extract_strided_slice %5 {offsets = [0, 0], sizes = [2, 2048], strides = [1, 1]} : vector<8x2048xf32> to vector<2x2048xf32>
    %c0_5 = arith.constant 0 : index
    %c0_6 = arith.constant 0 : index
    %c0_7 = arith.constant 0 : index
    %7 = vector.load %arg4[%c0_5, %c0_6, %c0_7] : memref<1x1x2048xf32, #tpu.memory_space<vmem>>, vector<1x1x2048xf32>
    %8 = vector.shape_cast %7 : vector<1x1x2048xf32> to vector<1x2048xf32>
    %9 = vector.broadcast %8 : vector<1x2048xf32> to vector<2x2048xf32>
    %10 = arith.addf %6, %9 : vector<2x2048xf32>
    %c0_8 = arith.constant 0 : index
    %c0_9 = arith.constant 0 : index
    %11 = vector.load %arg5[%c0_8, %c0_9] : memref<2x2048xf32, #tpu.memory_space<vmem>>, vector<2x2048xf32>
    tpu.vector_store %arg5[%c0_8, %c0_9], %10 {strides = array<i32>} : memref<2x2048xf32, #tpu.memory_space<vmem>>, vector<2x2048xf32>,
    return
  }
  func.func @transform_0(%arg0: i32, %arg1: memref<2xi32, #tpu.memory_space<smem>>) -> (i32, i32, i32) {
    %0 = arith.index_cast %arg0 : i32 to index
    %1 = memref.load %arg1[%0] : memref<2xi32, #tpu.memory_space<smem>>
    %c0_i32 = arith.constant 0 : i32
    %c0_i32_0 = arith.constant 0 : i32
    %c0_i32_1 = arith.constant 0 : i32
    return %1, %c0_i32, %c0_i32_0 : i32, i32, i32
  }
  func.func @transform_1(%arg0: i32, %arg1: memref<2xi32, #tpu.memory_space<smem>>) -> (i32, i32, i32) {
    %c0_i32 = arith.constant 0 : i32
    %c0_i32_0 = arith.constant 0 : i32
    %c0_i32_1 = arith.constant 0 : i32
    return %arg0, %c0_i32, %c0_i32_0 : i32, i32, i32
  }
  func.func @transform_2(%arg0: i32, %arg1: memref<2xi32, #tpu.memory_space<smem>>) -> (i32, i32, i32) {
    %c0_i32 = arith.constant 0 : i32
    %c0_i32_0 = arith.constant 0 : i32
    %c0_i32_1 = arith.constant 0 : i32
    return %arg0, %c0_i32, %c0_i32_0 : i32, i32, i32
  }
  func.func @transform_3(%arg0: i32, %arg1: memref<2xi32, #tpu.memory_space<smem>>) -> (i32, i32) {
    %c0_i32 = arith.constant 0 : i32
    %c0_i32_0 = arith.constant 0 : i32
    return %c0_i32, %arg0 : i32, i32
  }
}

</mosaic_0001>

<bundles_post_ra>
// kernel: _lodpca_fused.1
= control target key start
LH: loop header
LB: loop body
LE: loop exit
PB: predicated region body
PF: predicated region fallthrough
CT: control target
= control target key end

     0   :  { %s1098_s18 = smov [#allocation3]   ;;  %s1372_s0 = inlined_call_operand.vmem [shape: s32[2], index: 0, kind: input, shape index: {}]   ;;  %s1373_s1 = inlined_call_operand.vmem [shape: f32[2,8,16], index: 1, kind: input, shape index: {}]   ;;  %s1374_s2 = inlined_call_operand.hbm [shape: bf16[2,16,2048], index: 2, kind: input, shape index: {}]   ;;  %s1375_s3 = inlined_call_operand.hbm [shape: f32[2,1,2048], index: 3, kind: input, shape index: {}]   ;;  %s1376_s4 = inlined_call_operand.hbm [shape: f32[2,4096], index: 4, kind: output, shape index: {}]  }
   0x1   :  { %1377 = sst [smem:[#allocation14_spill]] %s1374_s2  ;;  %s10_s17 = sshll.u32 %s1372_s0, 4  ;;  %s11_s17 = int_to_ptr.vmem [resolvable:$true] %s10_s17 }
   0x2   :  { %13 = dma.vmem_to_smem %s11_s17, 16, %s1098_s18, [#allocation2] }
   0x3   :  { %1068 = dma.done.wait [#allocation2], 16 }
   0x4   :  { %1069 = vsyncadd [#allocation2], 4294967280 }
   0x5   :  { %16 = sfence }
   0x6   :  { %17 = vsyncpa [#allocation5], 0 }
   0x7   :  { %19 = vsyncpa [#allocation5 + $0x1], 0 }
   0x8   :  { %20 = vsyncpa [#allocation8], 0 }
   0x9   :  { %22 = vsyncpa [#allocation8 + $0x1], 0 }
   0xa   :  { %23 = vsyncpa [#allocation6], 0 }
   0xb   :  { %25 = vsyncpa [#allocation6 + $0x1], 0  ;;  %s1129_s19 = smov 0   ;;  %s1131_s20 = smov 0  }
   0xc   :  { %s1133_s21 = smov 0   ;;  %s1135_s22 = smov 0  }
   0xd LB: > { %s1150_s0 = sadd.s32 4294967295, %s1096_s22   ;;  %s862_s23 = sadd.s32 4294967294, %s1096_s22   ;;  %s1096_s22 = sphi %s1135_s22, %s1389_s22   ;;  %s1092_s21 = sphi %s1133_s21, %s1388_s21   ;;  %s1088_s20 = sphi %s1131_s20, %s1387_s20   ;;  %s1084_s19 = sphi %s1129_s19, %s1386_s19  }
   0xe   : > { %s1154_s24 = sadd.s32 1, %s1096_s22   ;;  %s66_s25 = sadd.s32 1, %s1092_s21 }
   0xf   : > { %s63_s26 = ssub.s32 %s1096_s22, %s1154_s24  ;;  %p73_p0 = scmp.ne.s32.totalorder %s1092_s21, %s1088_s20 }
  0x10   : > { %p64_p1 = scmp.eq.s32.totalorder %s63_s26, 0  ;;  %p74_p2 = scmp.eq.s32.totalorder %s1096_s22, 0 }
  0x11   : > { %p79_p3 = scmp.ne.s32.totalorder %s1088_s20, %s1084_s19  ;;  %p80_p4 = scmp.eq.s32.totalorder %s1150_s0, 0 }
  0x12   : > { %s1166_s27 = scalar_select %p64_p1, %s1092_s21, %s66_s25  }
  0x13   : > { %p1168_p5 = por %p74_p2, %p73_p0  ;;  %p1172_p6 = por %p80_p4, %p79_p3 }
  0x14   : > { %p129_p7 = scmp.eq.s32.totalorder %s1150_s0, 1  ;;  %p135_p8 = scmp.eq.s32.totalorder %s862_s23, 1 }
  0x15   : > { %p915_p10 = scmp.lt.s32.totalorder %s1096_s22, 2  ;;  %s1188_s6 = sand.u32 1, %s1092_s21  }
  0x16   : > { %p1179_p11 = por %p129_p7, %p73_p0  ;;  %p1183_p12 = por %p135_p8, %p79_p3 }
  0x17   : > { %s896_s7 = sshll.u32 %s1096_s22, 7  ;;  %s865_s8 = sshll.u32 %s1188_s6, 7 }
  0x18   : > { %s1382_s2 = sld [smem:[#allocation14_spill]]  ;;  %s168_s13 = scalar_lea.vmem [#allocation4], %s865_s8 }
  0x19   : > { %s176_s14 = sshll.u32 %s168_s13, 4  ;;  %p1197_p13 = pnand %p915_p10, %p1168_p5  ;;  %s177_s14 = int_to_ptr.vmem [resolvable:$true] %s176_s14 }
  0x1a   : > { %p870_p0 = scmp.ge.s32.totalorder %s1096_s22, 1  ;;  %p203_p1 = scmp.lt.s32.totalorder %s1096_s22, 3 }
  0x1b   : > { %s165_s16 = scalar_lea.sflag [#allocation5], %s1188_s6  ;;  %p968_p3 = pneg %p1197_p13 }
  0x1e   : > { %s173_s11 = scalar_lea.hbm %s1382_s2, %s896_s7  ;;  %s971_s26 = scalar_lea.hbm %s1382_s2, 256 }
  0x1f   : > { %s174_s12 = sshll.u32 %s173_s11, 4  ;;  %s175_s12 = int_to_ptr.hbm [resolvable:$true] %s174_s12 }
  0x20   : > { %s964_s17 = sshra.s32 %s175_s12, 4  ;;  %s965_s17 = int_to_ptr.hbm [resolvable:$true] %s964_s17 }
  0x21   : > { %s966_s18 = scalar_lea.hbm %s965_s17, 128  ;;  %p972_p5 = scmp.lt.s32.totalorder %s965_s17, %s1382_s2 }
  0x22   : > { %p967_p2 = scmp.ne.s32.totalorder %s965_s17, %s966_s18  ;;  %p973_p8 = scmp.lt.s32.totalorder %s971_s26, %s966_s18 }
  0x24   : > { %p969_p4 = pnand %p968_p3, %p967_p2  ;;  %p974_p10 = por %p973_p8, %p972_p5 }
  0x26   : > { %p970_p7 = pneg %p969_p4 }
  0x28   : > { %p975_p9 = pnand %p974_p10, %p970_p7 }
  0x2a   : > { %978 = shalt.err (!%p975_p9)
}
  0x2b   : > { %s1099_s8 = smov 1024   ;;  %s1100_s9 = smov 64  }
  0x2c   : > { %907 = dma.hbm_to_vmem [thread:$0]  (!%p1197_p13), %s175_s12, 2048, %s177_s14, %s165_s16, %s1099_s8, %s1099_s8, %s1100_s9  }
  0x2d   : > { %p1221_p2 = pnand %p870_p0, %p203_p1  ;;  %s868_s11 = sshll.u32 %s1188_s6, 4 }
  0x2e   : > { %s869_s13 = sshll.u32 %s1096_s22, 4  ;;  %s190_s26 = scalar_lea.vmem [#allocation7], %s868_s11 }
  0x2f   : > { %s194_s23 = scalar_lea.hbm %s1375_s3, %s869_s13  ;;  %s198_s28 = sshll.u32 %s190_s26, 4  ;;  %s199_s28 = int_to_ptr.vmem [resolvable:$true] %s198_s28 }
  0x30   : > { %s196_s25 = sshll.u32 %s194_s23, 4  ;;  %s187_s7 = scalar_lea.sflag [#allocation8], %s1188_s6  ;;  %s197_s25 = int_to_ptr.hbm [resolvable:$true] %s196_s25 }
  0x31   : > { %s994_s2 = sshra.s32 %s197_s25, 4  ;;  %s1001_s8 = scalar_lea.hbm %s1375_s3, 32  ;;  %s995_s2 = int_to_ptr.hbm [resolvable:$true] %s994_s2 }
  0x32   : > { %s996_s12 = scalar_lea.hbm %s995_s2, 16  ;;  %p1002_p4 = scmp.lt.s32.totalorder %s995_s2, %s1375_s3 }
  0x33   : > { %p997_p9 = scmp.ne.s32.totalorder %s995_s2, %s996_s12  ;;  %p1003_p7 = scmp.lt.s32.totalorder %s1001_s8, %s996_s12 }
  0x35   : > { %p999_p0 = pnand %p997_p9, %p968_p3  ;;  %p1004_p5 = por %p1003_p7, %p1002_p4 }
  0x37   : > { %p1000_p1 = pneg %p999_p0 }
  0x39   : > { %p1005_p8 = pnand %p1004_p5, %p1000_p1 }
  0x3b   : > { %1008 = shalt.err (!%p1005_p8)
}
  0x3c   : > { %910 = dma.hbm_to_vmem [thread:$0]  (!%p1197_p13), %s197_s25, 256, %s199_s28, %s187_s7  }
  0x3d   : > { %207 = sbr.rel (%p1221_p2) target bundleno = 247 (0xf7), region = 32  ;;  %s1245_s6 = sand.u32 (!%p1221_p2), 1, %s1088_s20  }
  0x3e   : > { %s871_s11 = sshll.u32 (!%p1221_p2), %s1245_s6, 7  ;;  %s210_s17 = scalar_lea.sflag (!%p1221_p2), [#allocation5], %s1245_s6 }
  0x3f   : > { %s1249_s18 = scalar_lea.vmem (!%p1221_p2), [#allocation4], %s871_s11 }
  0x42   : > { %1071 = dma.done.wait (%p1172_p6), %s210_s17, 2048  }
  0x43   : > { %1073 = vsyncadd (%p1172_p6), %s210_s17, 4294965248  ;;  %s872_s2 = sshll.u32 %s1245_s6, 4  ;;  %s220_s15 = scalar_lea.sflag [#allocation8], %s1245_s6 }
  0x44   : > { %s1257_s10 = scalar_lea.vmem [#allocation7], %s872_s2 }
  0x45   : > { %1075 = dma.done.wait (%p1172_p6), %s220_s15, 256  }
  0x46   : > { %1077 = vsyncadd (%p1172_p6), %s220_s15, 4294967040  ;;  %s257_s23 = sld [smem:[#allocation3 + %s1150_s0]]  ;;  %v274_v0 = vld [vmem:[%s1249_s18 + $0x48] sm:$0xff]  ;;  %v276_v2 = vld [vmem:[%s1249_s18 + $0x58] sm:$0xff]  ;;  %vm313_vm0 = vcmask 130048   ;;  %vm717_vm1 = vcmask 1041408  }
  0x47   : > { %v266_v1 = vld [vmem:[%s1249_s18 + $0x8] sm:$0xff]  ;;  %v299_v3 = vunpack.c.l.bf16 %v274_v0  ;;  %v300_v4 = vunpack.c.h.bf16 %v274_v0  ;;  %v273_v7 = vld [vmem:[%s1249_s18 + $0x40] sm:$0xff]  ;;  %v268_v8 = vld [vmem:[%s1249_s18 + $0x18] sm:$0xff]  ;;  %v303_v9 = vunpack.c.l.bf16 %v276_v2  ;;  %v304_v10 = vunpack.c.h.bf16 %v276_v2  ;;  %s873_s7 = sshll.u32 %s1245_s6, 5  ;;  %s897_s14 = sshll.u32 %s1150_s0, 5 }
  0x48   : > { %v283_v5 = vunpack.c.l.bf16 %v266_v1  ;;  %v284_v6 = vunpack.c.h.bf16 %v266_v1  ;;  %v298_v11 = vunpack.c.h.bf16 %v273_v7  ;;  %v265_v12 = vld [vmem:[%s1249_s18] sm:$0xff]  ;;  %v278_v13 = vld [vmem:[%s1249_s18 + $0x68] sm:$0xff]  ;;  %v287_v14 = vunpack.c.l.bf16 %v268_v8  ;;  %v275_v16 = vld [vmem:[%s1249_s18 + $0x50] sm:$0xff]  ;;  %s1322_s12 = scalar_lea.vmem [#allocation9], %s873_s7  ;;  %s752_s9 = scalar_lea.hbm %s1376_s4, %s897_s14 }
  0x49   : > { %371 = vmatpush.msra.mxu2 %v299_v3  ;;  %391 = vmatpush.msra.mxu3 %v300_v4  ;;  %v288_v15 = vunpack.c.h.bf16 %v268_v8  ;;  %v297_v17 = vunpack.c.l.bf16 %v273_v7  ;;  %v282_v18 = vunpack.c.h.bf16 %v265_v12  ;;  %v307_v20 = vunpack.c.l.bf16 %v278_v13  ;;  %v267_v21 = vld [vmem:[%s1249_s18 + $0x10] sm:$0xff]  ;;  %v270_v24 = vld [vmem:[%s1249_s18 + $0x28] sm:$0xff]  ;;  %v277_v28 = vld [vmem:[%s1249_s18 + $0x60] sm:$0xff]  ;;  %s754_s0 = sshll.u32 %s1322_s12, 4  ;;  %s756_s13 = sshll.u32 %s752_s9, 4  ;;  %s755_s0 = int_to_ptr.vmem [resolvable:$true] %s754_s0  ;;  %s757_s13 = int_to_ptr.hbm [resolvable:$true] %s756_s13 }
  0x4a   : > { %351 = vmatpush.msra.mxu1 %v298_v11  ;;  %v302_v22 = vunpack.c.h.bf16 %v275_v16  ;;  %v281_v23 = vunpack.c.l.bf16 %v265_v12  ;;  %v308_v25 = vunpack.c.h.bf16 %v278_v13  ;;  %v301_v26 = vunpack.c.l.bf16 %v275_v16  ;;  %v280_v31 = vld [vmem:[%s1249_s18 + $0x78] sm:$0xff]  ;;  %v269_v34 = vld [vmem:[%s1249_s18 + $0x20] sm:$0xff]  ;;  %v279_v39 = vld [vmem:[%s1249_s18 + $0x70] sm:$0xff]  ;;  %s741_s11 = scalar_lea.sflag [#allocation6], %s1245_s6  ;;  %s1038_s17 = sshra.s32 %s757_s13, 4  ;;  %s1039_s17 = int_to_ptr.hbm [resolvable:$true] %s1038_s17 }
  0x4b   : > { %372 = vmatpush.msra.mxu2 %v283_v5  ;;  %392 = vmatpush.msra.mxu3 %v284_v6  ;;  %v286_v27 = vunpack.c.h.bf16 %v267_v21  ;;  %v291_v29 = vunpack.c.l.bf16 %v270_v24  ;;  %v292_v30 = vunpack.c.h.bf16 %v270_v24  ;;  %v285_v32 = vunpack.c.l.bf16 %v267_v21  ;;  %v272_v37 = vld [vmem:[%s1249_s18 + $0x38] sm:$0xff]  ;;  %v271_v45 = vld [vmem:[%s1249_s18 + $0x30] sm:$0xff]  ;;  %s1040_s18 = scalar_lea.hbm %s1039_s17, 32  ;;  %p1045_p2 = scmp.lt.s32.totalorder %s1039_s17, %s1376_s4 }
  0x4c   : > { %p258_p13 = scmp.lt.s32.totalorder %s257_s23, 1  ;;  %331 = vmatpush.msra.mxu0 %v297_v17  ;;  %352 = vmatpush.msra.mxu1 %v282_v18  ;;  %v306_v33 = vunpack.c.h.bf16 %v277_v28  ;;  %v305_v35 = vunpack.c.l.bf16 %v277_v28  ;;  %v311_v36 = vunpack.c.l.bf16 %v280_v31  ;;  %v312_v38 = vunpack.c.h.bf16 %v280_v31  ;;  %v637_v49 = vld [vmem:[%s1257_s10] sm:$0xff]  ;;  %v638_v11 = vld [vmem:[%s1257_s10 + $0x8] sm:$0xff]  ;;  %p1041_p6 = scmp.ne.s32.totalorder %s1039_s17, %s1040_s18 }
  0x4d   : > { %451 = vmatpush.msrb.mxu2 %v303_v9  ;;  %471 = vmatpush.msrb.mxu3 %v304_v10  ;;  %v290_v40 = vunpack.c.h.bf16 %v269_v34  ;;  %v289_v41 = vunpack.c.l.bf16 %v269_v34  ;;  %v295_v42 = vunpack.c.l.bf16 %v272_v37  ;;  %v296_v43 = vunpack.c.h.bf16 %v272_v37  ;;  %s1044_s10 = scalar_lea.hbm %s1376_s4, 64 }
  0x4e   : > { %s1391_s23 = smov (!%p258_p13, %s257_s23), 1  ;;  %431 = vmatpush.msrb.mxu1 %v302_v22  ;;  %332 = vmatpush.msra.mxu0 %v281_v23  ;;  %v310_v44 = vunpack.c.h.bf16 %v279_v39  ;;  %v309_v46 = vunpack.c.l.bf16 %v279_v39  ;;  %v294_v47 = vunpack.c.h.bf16 %v271_v45  ;;  %v293_v48 = vunpack.c.l.bf16 %v271_v45  ;;  %p1042_p3 = pnand %p1041_p6, %p1179_p11 }
  0x4f   : > { %s874_s29 = sshll.u32 %s1391_s23, 3  ;;  %452 = vmatpush.msrb.mxu2 %v287_v14  ;;  %472 = vmatpush.msrb.mxu3 %v288_v15  ;;  %v642_v50 = vperm.slane %v637_v49, 1  ;;  %v641_v51 = vperm.slane %v637_v49, 0  ;;  %v643_v53 = vperm.slane %v637_v49, 2  ;;  %v644_v54 = vperm.slane %v637_v49, 3  ;;  %p1046_p9 = scmp.lt.s32.totalorder %s1044_s10, %s1040_s18 }
  0x50   : > { %s261_s28 = scalar_lea.vmem %s1373_s1, %s874_s29  ;;  %411 = vmatpush.msrb.mxu0 %v301_v26  ;;  %432 = vmatpush.msrb.mxu1 %v286_v27  ;;  %vm719_vm2 = vcmask 1045508   ;;  %v646_v63 = vperm.slane %v637_v49, 5  ;;  %vm721_vm3 = vcmask 1043456   ;;  %v645_v3 = vperm.slane %v637_v49, 4  ;;  %p1043_p10 = pneg %p1042_p3 }
  0x51   : > { %v1275_v19 = vld [vmem:[%s261_s28] sm:$0xff]  ;;  %v647_v6 = vperm.slane %v637_v49, 6  ;;  %v648_v7 = vperm.slane %v637_v49, 7  ;;  %v650_v18 = vperm.slane %v638_v11, 1  ;;  %v649_v22 = vperm.slane %v638_v11, 0  ;;  %p1047_p0 = por %p1046_p9, %p1045_p2 }
  0x52   : > { %877 = vmatmul.msk.f32.vlgmr.msra.gmra.mxu2 %vm313_vm0, %v1275_v19  ;;  %878 = vmatmul.msk.f32.vlgmr.msra.gmra.mxu3 %vm313_vm0, %v1275_v19  ;;  %v652_v26 = vperm.slane %v638_v11, 3 }
  0x53   : > { %876 = vmatmul.msk.f32.vlgmr.msra.gmra.mxu1 %vm313_vm0, %v1275_v19  ;;  %531 = vmatpush.msra.mxu2 %v307_v20  ;;  %p1048_p1 = pnand %p1047_p0, %p1043_p10 }
  0x54   : > { %875 = vmatmul.msk.f32.vlgmr.msra.gmra.mxu0 %vm313_vm0, %v1275_v19  ;;  %551 = vmatpush.msra.mxu3 %v308_v25  ;;  %v651_v25 = vperm.slane %v638_v11, 2 }
  0x55   : > { %532 = vmatpush.msra.mxu2 %v291_v29  ;;  %412 = vmatpush.msrb.mxu0 %v285_v32 }
  0x56   : > { %552 = vmatpush.msra.mxu3 %v292_v30  ;;  %511 = vmatpush.msra.mxu1 %v306_v33 }
  0x57   : > { %491 = vmatpush.msra.mxu0 %v305_v35 }
  0x58   : > { %512 = vmatpush.msra.mxu1 %v290_v40  ;;  %v653_v40 = vperm.slane %v638_v11, 4 }
  0x59   : > { %492 = vmatpush.msra.mxu0 %v289_v41 }
  0x5a   : > { %881 = vmatmul.msk.f32.vlgmr.msrb.gmra.mxu2 %vm313_vm0, %v1275_v19  ;;  %882 = vmatmul.msk.f32.vlgmr.msrb.gmra.mxu3 %vm313_vm0, %v1275_v19 }
  0x5b   : > { %611 = vmatpush.msrb.mxu2 %v311_v36  ;;  %880 = vmatmul.msk.f32.vlgmr.msrb.gmra.mxu1 %vm313_vm0, %v1275_v19  ;;  %v654_v36 = vperm.slane %v638_v11, 5 }
  0x5c   : > { %631 = vmatpush.msrb.mxu3 %v312_v38  ;;  %879 = vmatmul.msk.f32.vlgmr.msrb.gmra.mxu0 %vm313_vm0, %v1275_v19 }
  0x5d   : > { %612 = vmatpush.msrb.mxu2 %v295_v42  ;;  %591 = vmatpush.msrb.mxu1 %v310_v44  ;;  %v656_v44 = vperm.slane %v638_v11, 7 }
  0x5e   : > { %632 = vmatpush.msrb.mxu3 %v296_v43  ;;  %571 = vmatpush.msrb.mxu0 %v309_v46  ;;  %v655_v43 = vperm.slane %v638_v11, 6 }
  0x5f   : > { %592 = vmatpush.msrb.mxu1 %v294_v47 }
  0x60   : > { %572 = vmatpush.msrb.mxu0 %v293_v48 }
  0x62   : > { %885 = vmatmul.msk.f32.vlgmr.msra.gmra.mxu2 %vm313_vm0, %v1275_v19  ;;  %886 = vmatmul.msk.f32.vlgmr.msra.gmra.mxu3 %vm313_vm0, %v1275_v19 }
  0x63   : > { %884 = vmatmul.msk.f32.vlgmr.msra.gmra.mxu1 %vm313_vm0, %v1275_v19 }
  0x64   : > { %883 = vmatmul.msk.f32.vlgmr.msra.gmra.mxu0 %vm313_vm0, %v1275_v19 }
  0x6a   : > { %889 = vmatmul.msk.f32.vlgmr.msrb.gmra.mxu2 %vm313_vm0, %v1275_v19  ;;  %890 = vmatmul.msk.f32.vlgmr.msrb.gmra.mxu3 %vm313_vm0, %v1275_v19 }
  0x6b   : > { %888 = vmatmul.msk.f32.vlgmr.msrb.gmra.mxu1 %vm313_vm0, %v1275_v19 }
  0x6c   : > { %887 = vmatmul.msk.f32.vlgmr.msrb.gmra.mxu0 %vm313_vm0, %v1275_v19 }
  0xd0   : > { %v354_v52 = vpop.f32.mrf.mxu1 }
  0xd1   : > { %v674_v55 = vadd.f32 %v642_v50, %v354_v52  ;;  %v334_v56 = vpop.f32.mrf.mxu0 }
  0xd2   : > { %v673_v60 = vadd.f32 %v641_v51, %v334_v56 }
  0xd3   : > { %v705_v57 = vrot.slane %v674_v55, 6 }
  0xd5   : > { %v374_v58 = vpop.f32.mrf.mxu2  ;;  %v394_v59 = vpop.f32.mrf.mxu3  ;;  %v718_v2 = vsel %vm717_vm1, %v673_v60, %v705_v57 }
  0xd6   : > { %v675_v61 = vadd.f32 %v643_v53, %v374_v58  ;;  %v676_v62 = vadd.f32 %v644_v54, %v394_v59 }
  0xd8   : > { %v706_v0 = vrot.slane %v675_v61, 4  ;;  %v707_v1 = vrot.slane %v676_v62, 2  ;;  %v434_v5 = vpop.f32.mrf.mxu1 }
  0xd9   : > { %v678_v9 = vadd.f32 %v646_v63, %v434_v5  ;;  %v414_v10 = vpop.f32.mrf.mxu0 }
  0xda   : > { %v720_v4 = vsel %vm719_vm2, %v706_v0, %v707_v1  ;;  %v677_v15 = vadd.f32 %v645_v3, %v414_v10 }
  0xdb   : > { %v722_v8 = vsel %vm721_vm3, %v718_v2, %v720_v4  ;;  %v708_v12 = vrot.slane %v678_v9, 6 }
  0xdc   : > { %736 = vst [vmem:[%s1322_s12] sm:$0xff] %v722_v8 }
  0xdd   : > { %v454_v13 = vpop.f32.mrf.mxu2  ;;  %v474_v14 = vpop.f32.mrf.mxu3  ;;  %v723_v21 = vsel %vm717_vm1, %v677_v15, %v708_v12 }
  0xde   : > { %v679_v16 = vadd.f32 %v647_v6, %v454_v13  ;;  %v680_v17 = vadd.f32 %v648_v7, %v474_v14 }
  0xe0   : > { %v709_v19 = vrot.slane %v679_v16, 4  ;;  %v710_v20 = vrot.slane %v680_v17, 2  ;;  %v514_v24 = vpop.f32.mrf.mxu1 }
  0xe1   : > { %v682_v28 = vadd.f32 %v650_v18, %v514_v24  ;;  %v494_v29 = vpop.f32.mrf.mxu0 }
  0xe2   : > { %v724_v23 = vsel %vm719_vm2, %v709_v19, %v710_v20  ;;  %v681_v33 = vadd.f32 %v649_v22, %v494_v29 }
  0xe3   : > { %v725_v27 = vsel %vm721_vm3, %v723_v21, %v724_v23  ;;  %v711_v30 = vrot.slane %v682_v28, 6 }
  0xe4   : > { %737 = vst [vmem:[%s1322_s12 + $0x8] sm:$0xff] %v725_v27 }
  0xe5   : > { %v534_v31 = vpop.f32.mrf.mxu2  ;;  %v554_v32 = vpop.f32.mrf.mxu3  ;;  %v726_v39 = vsel %vm717_vm1, %v681_v33, %v711_v30 }
  0xe6   : > { %v683_v34 = vadd.f32 %v651_v25, %v534_v31  ;;  %v684_v35 = vadd.f32 %v652_v26, %v554_v32 }
  0xe8   : > { %v712_v37 = vrot.slane %v683_v34, 4  ;;  %v713_v38 = vrot.slane %v684_v35, 2  ;;  %v594_v42 = vpop.f32.mrf.mxu1 }
  0xe9   : > { %v686_v46 = vadd.f32 %v654_v36, %v594_v42  ;;  %v574_v47 = vpop.f32.mrf.mxu0 }
  0xea   : > { %v727_v41 = vsel %vm719_vm2, %v712_v37, %v713_v38  ;;  %v685_v51 = vadd.f32 %v653_v40, %v574_v47 }
  0xeb   : > { %v728_v45 = vsel %vm721_vm3, %v726_v39, %v727_v41  ;;  %v714_v48 = vrot.slane %v686_v46, 6 }
  0xec   : > { %738 = vst [vmem:[%s1322_s12 + $0x10] sm:$0xff] %v728_v45 }
  0xed   : > { %v614_v49 = vpop.f32.mrf.mxu2  ;;  %v634_v50 = vpop.f32.mrf.mxu3  ;;  %v729_v56 = vsel %vm717_vm1, %v685_v51, %v714_v48 }
  0xee   : > { %v687_v52 = vadd.f32 %v655_v43, %v614_v49  ;;  %v688_v53 = vadd.f32 %v656_v44, %v634_v50 }
  0xf0   : > { %v715_v54 = vrot.slane %v687_v52, 4  ;;  %v716_v55 = vrot.slane %v688_v53, 2 }
  0xf2   : > { %v730_v57 = vsel %vm719_vm2, %v715_v54, %v716_v55 }
  0xf3   : > { %v731_v58 = vsel %vm721_vm3, %v729_v56, %v730_v57 }
  0xf4   : > { %739 = vst [vmem:[%s1322_s12 + $0x18] sm:$0xff] %v731_v58 }
  0xf5   : > { %1051 = shalt.err (!%p1048_p1)
}
  0xf6   : > { %902 = dma.vmem_to_hbm [thread:$0]  (%p1179_p11), %s755_s0, 512, %s757_s13, %s741_s11  }
  0xf7 PF: > { %s768_s6 = sand.u32 1, %s1084_s19   ;;  %p1385_p4 = scmp.ge.s32.totalorder %s1096_s22, 2 }
  0xf8   : > { %s769_s25 = scalar_lea.sflag [#allocation6], %s768_s6 }
  0xf9   : > { %p912_p7 = pnand %p1385_p4, %p1183_p12 }
  0xfb   : > { %p913_p5 = pneg %p912_p7 }
  0xfd   : > { %1079 = dma.done.wait (%p913_p5), %s769_s25, 512  }
  0xfe   : > { %1081 = vsyncadd (%p913_p5), %s769_s25, 4294966784  ;;  %p28_p8 = scmp.ge.s32.totalorder %s1154_s24, 4   ;;  %s1386_s19 = smov %s1088_s20 }
  0xff   : > { %s1387_s20 = smov %s1092_s21  ;;  %s1388_s21 = smov %s1166_s27 }
 0x100   : > { %s1389_s22 = smov %s1154_s24  ;;  %30 = sbr.rel (!%p28_p8) target bundleno = 13 (0xd), region = 93 }
 0x105   :  { %775 = vsyncpa [#allocation5], 1 }
 0x106   :  { %777 = vsyncpa [#allocation5 + $0x1], 1 }
 0x107   :  { %778 = vsyncpa [#allocation8], 1 }
 0x108   :  { %780 = vsyncpa [#allocation8 + $0x1], 1 }
 0x109   :  { %781 = vsyncpa [#allocation6], 1 }
 0x10a   :  { %783 = vsyncpa [#allocation6 + $0x1], 1 }

</bundles_post_ra>
